<compile_context>
chip_gen: v7x
topology: tpu7x:2x2x1
jax: 0.10.0
libtpu: 0.0.40
codegen_flags: <defaults>
</compile_context>

<pallas_src>
import functools

import jax
import jax.numpy as jnp
import numpy as np
from jax.experimental import pallas as pl
from jax.experimental.pallas import tpu as pltpu

_LANE = 128
_MAX_BLOCK_ROWS = 2048  # 1 MiB per stream per buffer at f32; <=12 MiB double-buffered

# ---------------------------------------------------------------------------
# erfc approximation (Abramowitz & Stegun 7.1.26, |abs err| < 1.5e-7) built
# from ops that lower cleanly in Mosaic (abs / mul / add / exp / where).
# ---------------------------------------------------------------------------
_A1, _A2, _A3, _A4, _A5 = 0.254829592, -0.284496736, 1.421413741, -1.453152027, 1.061405429
_P = 0.3275911


def _erfc_poly(ax):
    # erfc(ax) for ax >= 0
    t = 1.0 / (1.0 + _P * ax)
    poly = t * (_A1 + t * (_A2 + t * (_A3 + t * (_A4 + t * _A5))))
    return poly * jnp.exp(-ax * ax)


def _std_cumulative(x, *, arg_nonpositive=False):
    # Phi(x) = 0.5 * erfc(-x / sqrt(2))
    z = (-(2.0 ** -0.5)) * x
    if arg_nonpositive:
        # x <= 0  ==>  z >= 0, so erfc(z) is the polynomial branch directly
        # (drops an abs + compare + select per element).
        return 0.5 * _erfc_poly(z)
    y = _erfc_poly(jnp.abs(z))
    return 0.5 * jnp.where(z >= 0.0, y, 2.0 - y)


# ---------------------------------------------------------------------------
# Pallas kernel: quantize (noise or dequantize) + Gaussian likelihood.
# Specialized at trace time on (training, has_means) so unused streams are
# never DMA'd.
# ---------------------------------------------------------------------------
def _gc_kernel(*refs, training: bool, has_means: bool,
               scale_bound: float, likelihood_bound: float):
    it = iter(refs)
    x_ref = next(it)
    s_ref = next(it)
    m_ref = next(it) if has_means else None
    n_ref = next(it) if training else None
    out_ref = next(it)
    lik_ref = next(it)

    x = x_ref[...]
    m = m_ref[...] if has_means else None

    if training:
        outputs = x + n_ref[...]                 # additive U(-0.5, 0.5) noise
    elif has_means:
        outputs = jnp.round(x - m) + m           # dequantize
    else:
        outputs = jnp.round(x)
    out_ref[...] = outputs

    # LowerBound(scale_bound); one shared reciprocal instead of two divisions.
    inv_s = 1.0 / jnp.maximum(s_ref[...], scale_bound)
    values = jnp.abs(outputs - m) if has_means else jnp.abs(outputs)
    upper = _std_cumulative((0.5 - values) * inv_s)
    lower = _std_cumulative((-0.5 - values) * inv_s, arg_nonpositive=True)
    likelihood = upper - lower
    lik_ref[...] = jnp.maximum(likelihood, likelihood_bound)  # LowerBound(1e-9)


# ---------------------------------------------------------------------------
# Wrapper
# ---------------------------------------------------------------------------
def gaussian_conditional_forward(inputs, scales, means=None, *, training=False,
                                 scale_bound=0.11, likelihood_bound=1e-9,
                                 rng_key=None):
    """Returns (outputs, likelihood), both with the same NCHW shape as `inputs`."""
    orig_shape = inputs.shape
    orig_dtype = inputs.dtype
    n = int(np.prod(orig_shape))

    # Choose an adaptive lane-dense tiling: big blocks for big tensors, a single
    # full-extent block for small ones, minimal row padding in between.
    rows = -(-n // _LANE)                                   # ceil(n / 128)
    g = max(1, -(-rows // _MAX_BLOCK_ROWS))                 # grid steps
    block_rows = -(-rows // g)
    block_rows = -(-block_rows // 8) * 8                    # sublane multiple
    rows_padded = g * block_rows
    n_pad = rows_padded * _LANE
    needs_pad = n_pad != n

    def prep(a):
        flat = jnp.ravel(a).astype(jnp.float32)
        if needs_pad:
            flat = jnp.pad(flat, (0, n_pad - n))
        return flat.reshape(rows_padded, _LANE)

    has_means = means is not None
    operands = [prep(inputs), prep(scales)]
    if has_means:
        operands.append(prep(means))
    if training:
        if rng_key is None:
            rng_key = jax.random.PRNGKey(0)
        # TODO(synk): torch draws noise with its own uniform_ RNG stream; here it is
        # generated host-side with jax.random (same distribution, different
        # realization).  In-kernel pltpu.prng_* would avoid this extra HBM stream
        # but does not lower under TPU interpret mode.
        noise = jax.random.uniform(rng_key, (rows_padded, _LANE), jnp.float32,
                                   minval=-0.5, maxval=0.5)
        operands.append(noise)

    kernel = functools.partial(
        _gc_kernel,
        training=bool(training),
        has_means=has_means,
        scale_bound=float(scale_bound),
        likelihood_bound=float(likelihood_bound),
    )

    spec = pl.BlockSpec((block_rows, _LANE), lambda i: (i, 0))
    out2, lik2 = pl.pallas_call(
        kernel,
        out_shape=(
            jax.ShapeDtypeStruct((rows_padded, _LANE), jnp.float32),
            jax.ShapeDtypeStruct((rows_padded, _LANE), jnp.float32),
        ),
        grid=(g,),
        in_specs=[spec] * len(operands),
        out_specs=(spec, spec),
        compiler_params=pltpu.CompilerParams(
            dimension_semantics=("parallel",),       # blocks are independent
            vmem_limit_bytes=32 * 1024 * 1024,        # <=12 MiB used; safe on v5e/v6e/v7x
        ),
    )(*operands)

    def post(a):
        flat = a.reshape(-1)
        if needs_pad:
            flat = flat[:n]
        return flat.reshape(orig_shape).astype(orig_dtype)

    return post(out2), post(lik2)


# ---------------------------------------------------------------------------
# Pure-JAX reference (exact erfc) for the deterministic eval path.
# ---------------------------------------------------------------------------
def _reference_forward(inputs, scales, means=None, scale_bound=0.11,
                       likelihood_bound=1e-9):
    m = means if means is not None else jnp.zeros_like(inputs)
    outputs = jnp.round(inputs - m) + m
    s = jnp.maximum(scales, scale_bound)
    v = jnp.abs(outputs - m)
    const = -(2.0 ** -0.5)
    upper = 0.5 * jax.scipy.special.erfc(const * (0.5 - v) / s)
    lower = 0.5 * jax.scipy.special.erfc(const * (-0.5 - v) / s)
    lik = jnp.maximum(upper - lower, likelihood_bound)
    return outputs, lik


if __name__ == "__main__":
    key = jax.random.PRNGKey(0)
    k1, k2, k3, k4 = jax.random.split(key, 4)

    B, C, H, W = 2, 4, 16, 16  # NCHW, matching PyTorch convention
    inputs = jax.random.normal(k1, (B, C, H, W), dtype=jnp.float32) * 3.0
    scales = jax.random.uniform(k2, (B, C, H, W), dtype=jnp.float32,
                                minval=0.05, maxval=2.0)
    means = jax.random.normal(k3, (B, C, H, W), dtype=jnp.float32) * 0.5

    # Eval path with means: check against exact-erfc JAX reference.
    out, lik = gaussian_conditional_forward(inputs, scales, means, training=False)
    out, lik = jax.block_until_ready(out), jax.block_until_ready(lik)
    ref_out, ref_lik = _reference_forward(inputs, scales, means)
    assert out.shape == (B, C, H, W) and lik.shape == (B, C, H, W)
    np.testing.assert_allclose(np.asarray(out), np.asarray(ref_out), rtol=0, atol=1e-6)
    np.testing.assert_allclose(np.asarray(lik), np.asarray(ref_lik), rtol=0, atol=1e-5)

    # Eval path without means: specialized kernel (no means stream).
    out0, lik0 = gaussian_conditional_forward(inputs, scales, None, training=False)
    jax.block_until_ready((out0, lik0))
    ref_out0, ref_lik0 = _reference_forward(inputs, scales, None)
    np.testing.assert_allclose(np.asarray(out0), np.asarray(ref_out0), rtol=0, atol=1e-6)
    np.testing.assert_allclose(np.asarray(lik0), np.asarray(ref_lik0), rtol=0, atol=1e-5)

    # Training path: additive uniform noise in [-0.5, 0.5).
    out_t, lik_t = gaussian_conditional_forward(inputs, scales, means,
                                                training=True, rng_key=k4)
    jax.block_until_ready((out_t, lik_t))
    assert np.all(np.abs(np.asarray(out_t) - np.asarray(inputs)) <= 0.5 + 1e-6)
    assert np.all(np.asarray(lik_t) >= 1e-9)

    print("KERNEL_OK")
</pallas_src>

<mosaic_0001>
module attributes {stable_mosaic.version = 11 : i64} {
  func.func @_gc_kernel(%arg0: i32, %arg1: memref<16x128xf32, #tpu.memory_space<vmem>>, %arg2: memref<16x128xf32, #tpu.memory_space<vmem>>, %arg3: memref<16x128xf32, #tpu.memory_space<vmem>>, %arg4: memref<16x128xf32, #tpu.memory_space<vmem>>, %arg5: memref<16x128xf32, #tpu.memory_space<vmem>>) attributes {dimension_semantics = [#tpu.dimension_semantics<parallel>], iteration_bounds = array<i64: 1>, scalar_prefetch = 0 : i64, scratch_operands = 0 : i64, tpu.core_type = #tpu.core_type<tc>, window_params = [{transform_indices = @transform_0, window_bounds = array<i64: 16, 128>}, {transform_indices = @transform_1, window_bounds = array<i64: 16, 128>}, {transform_indices = @transform_2, window_bounds = array<i64: 16, 128>}, {transform_indices = @transform_3, window_bounds = array<i64: 16, 128>}, {transform_indices = @transform_4, window_bounds = array<i64: 16, 128>}]} {
    %c0 = arith.constant 0 : index
    %c0_0 = arith.constant 0 : index
    %0 = vector.load %arg1[%c0, %c0_0] : memref<16x128xf32, #tpu.memory_space<vmem>>, vector<16x128xf32>
    %c0_1 = arith.constant 0 : index
    %c0_2 = arith.constant 0 : index
    %1 = vector.load %arg3[%c0_1, %c0_2] : memref<16x128xf32, #tpu.memory_space<vmem>>, vector<16x128xf32>
    %2 = arith.subf %0, %1 : vector<16x128xf32>
    %3 = math.roundeven %2 : vector<16x128xf32>
    %4 = arith.addf %3, %1 : vector<16x128xf32>
    %c0_3 = arith.constant 0 : index
    %c0_4 = arith.constant 0 : index
    %5 = vector.load %arg4[%c0_3, %c0_4] : memref<16x128xf32, #tpu.memory_space<vmem>>, vector<16x128xf32>
    tpu.vector_store %arg4[%c0_3, %c0_4], %4 {strides = array<i32>} : memref<16x128xf32, #tpu.memory_space<vmem>>, vector<16x128xf32>,
    %c0_5 = arith.constant 0 : index
    %c0_6 = arith.constant 0 : index
    %6 = vector.load %arg2[%c0_5, %c0_6] : memref<16x128xf32, #tpu.memory_space<vmem>>, vector<16x128xf32>
    %cst = arith.constant 1.100000e-01 : f32
    %7 = vector.broadcast %cst : f32 to vector<16x128xf32>
    %8 = arith.maximumf %6, %7 : vector<16x128xf32>
    %cst_7 = arith.constant 1.000000e+00 : f32
    %9 = vector.broadcast %cst_7 : f32 to vector<16x128xf32>
    %10 = arith.divf %9, %8 : vector<16x128xf32>
    %11 = arith.subf %4, %1 : vector<16x128xf32>
    %12 = math.absf %11 : vector<16x128xf32>
    %cst_8 = arith.constant 5.000000e-01 : f32
    %13 = vector.broadcast %cst_8 : f32 to vector<16x128xf32>
    %14 = arith.subf %13, %12 : vector<16x128xf32>
    %15 = arith.mulf %14, %10 : vector<16x128xf32>
    %cst_9 = arith.constant -0.707106769 : f32
    %16 = vector.broadcast %cst_9 : f32 to vector<16x128xf32>
    %17 = arith.mulf %16, %15 : vector<16x128xf32>
    %18 = math.absf %17 : vector<16x128xf32>
    %cst_10 = arith.constant 0.327591091 : f32
    %19 = vector.broadcast %cst_10 : f32 to vector<16x128xf32>
    %20 = arith.mulf %19, %18 : vector<16x128xf32>
    %cst_11 = arith.constant 1.000000e+00 : f32
    %21 = vector.broadcast %cst_11 : f32 to vector<16x128xf32>
    %22 = arith.addf %21, %20 : vector<16x128xf32>
    %cst_12 = arith.constant 1.000000e+00 : f32
    %23 = vector.broadcast %cst_12 : f32 to vector<16x128xf32>
    %24 = arith.divf %23, %22 : vector<16x128xf32>
    %cst_13 = arith.constant 1.06140542 : f32
    %25 = vector.broadcast %cst_13 : f32 to vector<16x128xf32>
    %26 = arith.mulf %24, %25 : vector<16x128xf32>
    %cst_14 = arith.constant -1.45315206 : f32
    %27 = vector.broadcast %cst_14 : f32 to vector<16x128xf32>
    %28 = arith.addf %27, %26 : vector<16x128xf32>
    %29 = arith.mulf %24, %28 : vector<16x128xf32>
    %cst_15 = arith.constant 1.42141378 : f32
    %30 = vector.broadcast %cst_15 : f32 to vector<16x128xf32>
    %31 = arith.addf %30, %29 : vector<16x128xf32>
    %32 = arith.mulf %24, %31 : vector<16x128xf32>
    %cst_16 = arith.constant -0.284496725 : f32
    %33 = vector.broadcast %cst_16 : f32 to vector<16x128xf32>
    %34 = arith.addf %33, %32 : vector<16x128xf32>
    %35 = arith.mulf %24, %34 : vector<16x128xf32>
    %cst_17 = arith.constant 0.254829586 : f32
    %36 = vector.broadcast %cst_17 : f32 to vector<16x128xf32>
    %37 = arith.addf %36, %35 : vector<16x128xf32>
    %38 = arith.mulf %24, %37 : vector<16x128xf32>
    %cst_18 = arith.constant 0.000000e+00 : f32
    %39 = vector.broadcast %cst_18 : f32 to vector<16x128xf32>
    %40 = arith.subf %39, %18 : vector<16x128xf32>
    %41 = arith.mulf %40, %18 : vector<16x128xf32>
    %42 = math.exp %41 : vector<16x128xf32>
    %43 = arith.mulf %38, %42 : vector<16x128xf32>
    %cst_19 = arith.constant 0.000000e+00 : f32
    %44 = vector.broadcast %cst_19 : f32 to vector<16x128xf32>
    %45 = arith.cmpf oge, %17, %44 : vector<16x128xf32>
    %cst_20 = arith.constant 2.000000e+00 : f32
    %46 = vector.broadcast %cst_20 : f32 to vector<16x128xf32>
    %47 = arith.subf %46, %43 : vector<16x128xf32>
    %48 = arith.select %45, %43, %47 : vector<16x128xi1>, vector<16x128xf32>
    %cst_21 = arith.constant 5.000000e-01 : f32
    %49 = vector.broadcast %cst_21 : f32 to vector<16x128xf32>
    %50 = arith.mulf %49, %48 : vector<16x128xf32>
    %cst_22 = arith.constant -5.000000e-01 : f32
    %51 = vector.broadcast %cst_22 : f32 to vector<16x128xf32>
    %52 = arith.subf %51, %12 : vector<16x128xf32>
    %53 = arith.mulf %52, %10 : vector<16x128xf32>
    %cst_23 = arith.constant -0.707106769 : f32
    %54 = vector.broadcast %cst_23 : f32 to vector<16x128xf32>
    %55 = arith.mulf %54, %53 : vector<16x128xf32>
    %cst_24 = arith.constant 0.327591091 : f32
    %56 = vector.broadcast %cst_24 : f32 to vector<16x128xf32>
    %57 = arith.mulf %56, %55 : vector<16x128xf32>
    %cst_25 = arith.constant 1.000000e+00 : f32
    %58 = vector.broadcast %cst_25 : f32 to vector<16x128xf32>
    %59 = arith.addf %58, %57 : vector<16x128xf32>
    %cst_26 = arith.constant 1.000000e+00 : f32
    %60 = vector.broadcast %cst_26 : f32 to vector<16x128xf32>
    %61 = arith.divf %60, %59 : vector<16x128xf32>
    %cst_27 = arith.constant 1.06140542 : f32
    %62 = vector.broadcast %cst_27 : f32 to vector<16x128xf32>
    %63 = arith.mulf %61, %62 : vector<16x128xf32>
    %cst_28 = arith.constant -1.45315206 : f32
    %64 = vector.broadcast %cst_28 : f32 to vector<16x128xf32>
    %65 = arith.addf %64, %63 : vector<16x128xf32>
    %66 = arith.mulf %61, %65 : vector<16x128xf32>
    %cst_29 = arith.constant 1.42141378 : f32
    %67 = vector.broadcast %cst_29 : f32 to vector<16x128xf32>
    %68 = arith.addf %67, %66 : vector<16x128xf32>
    %69 = arith.mulf %61, %68 : vector<16x128xf32>
    %cst_30 = arith.constant -0.284496725 : f32
    %70 = vector.broadcast %cst_30 : f32 to vector<16x128xf32>
    %71 = arith.addf %70, %69 : vector<16x128xf32>
    %72 = arith.mulf %61, %71 : vector<16x128xf32>
    %cst_31 = arith.constant 0.254829586 : f32
    %73 = vector.broadcast %cst_31 : f32 to vector<16x128xf32>
    %74 = arith.addf %73, %72 : vector<16x128xf32>
    %75 = arith.mulf %61, %74 : vector<16x128xf32>
    %cst_32 = arith.constant 0.000000e+00 : f32
    %76 = vector.broadcast %cst_32 : f32 to vector<16x128xf32>
    %77 = arith.subf %76, %55 : vector<16x128xf32>
    %78 = arith.mulf %77, %55 : vector<16x128xf32>
    %79 = math.exp %78 : vector<16x128xf32>
    %80 = arith.mulf %75, %79 : vector<16x128xf32>
    %cst_33 = arith.constant 5.000000e-01 : f32
    %81 = vector.broadcast %cst_33 : f32 to vector<16x128xf32>
    %82 = arith.mulf %81, %80 : vector<16x128xf32>
    %83 = arith.subf %50, %82 : vector<16x128xf32>
    %cst_34 = arith.constant 9.99999971E-10 : f32
    %84 = vector.broadcast %cst_34 : f32 to vector<16x128xf32>
    %85 = arith.maximumf %83, %84 : vector<16x128xf32>
    %c0_35 = arith.constant 0 : index
    %c0_36 = arith.constant 0 : index
    %86 = vector.load %arg5[%c0_35, %c0_36] : memref<16x128xf32, #tpu.memory_space<vmem>>, vector<16x128xf32>
    tpu.vector_store %arg5[%c0_35, %c0_36], %85 {strides = array<i32>} : memref<16x128xf32, #tpu.memory_space<vmem>>, vector<16x128xf32>,
    return
  }
  func.func @transform_0(%arg0: i32) -> (i32, i32) {
    %c0_i32 = arith.constant 0 : i32
    %c0_i32_0 = arith.constant 0 : i32
    return %arg0, %c0_i32 : i32, i32
  }
  func.func @transform_1(%arg0: i32) -> (i32, i32) {
    %c0_i32 = arith.constant 0 : i32
    %c0_i32_0 = arith.constant 0 : i32
    return %arg0, %c0_i32 : i32, i32
  }
  func.func @transform_2(%arg0: i32) -> (i32, i32) {
    %c0_i32 = arith.constant 0 : i32
    %c0_i32_0 = arith.constant 0 : i32
    return %arg0, %c0_i32 : i32, i32
  }
  func.func @transform_3(%arg0: i32) -> (i32, i32) {
    %c0_i32 = arith.constant 0 : i32
    %c0_i32_0 = arith.constant 0 : i32
    return %arg0, %c0_i32 : i32, i32
  }
  func.func @transform_4(%arg0: i32) -> (i32, i32) {
    %c0_i32 = arith.constant 0 : i32
    %c0_i32_0 = arith.constant 0 : i32
    return %arg0, %c0_i32 : i32, i32
  }
}

</mosaic_0001>

<bundles_post_ra>
// kernel: tpu_custom_call.1
= control target key start
LH: loop header
LB: loop body
LE: loop exit
PB: predicated region body
PF: predicated region fallthrough
CT: control target
= control target key end

     0   :  { %10 = vsyncpa [#allocation3], 0  ;;  %s488_s0 = inlined_call_operand.hbm [shape: f32[16,128], index: 0, kind: input, shape index: {}]   ;;  %s489_s1 = inlined_call_operand.hbm [shape: f32[16,128], index: 1, kind: input, shape index: {}]   ;;  %s490_s2 = inlined_call_operand.hbm [shape: f32[16,128], index: 2, kind: input, shape index: {}]   ;;  %s491_s3 = inlined_call_operand.hbm [shape: f32[16,128], index: 3, kind: output, shape index: {0}]   ;;  %s492_s4 = inlined_call_operand.hbm [shape: f32[16,128], index: 4, kind: output, shape index: {1}]  }
   0x1   :  { %11 = vsyncpa [#allocation6], 0 }
   0x2   :  { %12 = vsyncpa [#allocation4], 0 }
   0x3   :  { %13 = vsyncpa [#allocation10], 0  ;;  %s366_s15 = smov [#allocation5]   ;;  %s367_s17 = smov [#allocation2]  }
   0x4   :  { %s31_s16 = sshll.u32 %s366_s15, 4  ;;  %s19_s18 = sshll.u32 %s367_s17, 4  ;;  %s32_s16 = int_to_ptr.vmem [resolvable:$true] %s31_s16  ;;  %s398_s18 = int_to_ptr.vmem [resolvable:$true] %s19_s18 }
   0x5   :  { %s248_s21 = scalar_lea.hbm %s489_s1, 256 }
   0x6   :  { %p249_p0 = scmp.ne.s32.totalorder %s489_s1, %s248_s21  ;;  %p252_p1 = scmp.lt.u32.totalorder %s248_s21, %s489_s1 }
   0x8   :  { %p254_p2 = pnand %p252_p1, %p249_p0 }
   0xa   :  { %257 = shalt.err (!%p254_p2)
}
   0xb   :  { %s258_s26 = scalar_lea.vmem %s32_s16, 256  ;;  %p263_p4 = scmp.lt.s32.totalorder %s32_s16, %s32_s16 }
   0xc   :  { %p259_p3 = scmp.ne.s32.totalorder %s32_s16, %s258_s26  ;;  %p264_p5 = scmp.lt.s32.totalorder %s258_s26, %s258_s26 }
   0xe   :  { %p265_p6 = por %p264_p5, %p263_p4 }
  0x10   :  { %p266_p7 = pnand %p265_p6, %p259_p3 }
  0x12   :  { %269 = shalt.err (!%p266_p7)
}
  0x13   :  { %s368_s27 = smov 128   ;;  %s369_s28 = smov 8  }
  0x14   :  { %37 = dma.hbm_to_vmem [thread:$0]  %s489_s1, 256, %s32_s16, [#allocation6], %s368_s27, %s368_s27, %s369_s28  }
  0x15   :  { %s270_s7 = scalar_lea.hbm %s488_s0, 256 }
  0x16   :  { %p271_p8 = scmp.ne.s32.totalorder %s488_s0, %s270_s7  ;;  %p274_p9 = scmp.lt.u32.totalorder %s270_s7, %s488_s0 }
  0x18   :  { %p276_p10 = pnand %p274_p9, %p271_p8 }
  0x1a   :  { %279 = shalt.err (!%p276_p10)
}
  0x1b   :  { %s280_s12 = scalar_lea.vmem %s398_s18, 256  ;;  %p285_p12 = scmp.lt.s32.totalorder %s398_s18, %s398_s18 }
  0x1c   :  { %p281_p11 = scmp.ne.s32.totalorder %s398_s18, %s280_s12  ;;  %p286_p13 = scmp.lt.s32.totalorder %s280_s12, %s280_s12 }
  0x1e   :  { %p287_p0 = por %p286_p13, %p285_p12 }
  0x20   :  { %p288_p1 = pnand %p287_p0, %p281_p11 }
  0x22   :  { %291 = shalt.err (!%p288_p1)
}
  0x23   :  { %25 = dma.hbm_to_vmem [thread:$0]  %s488_s0, 256, %s398_s18, [#allocation3], %s368_s27, %s368_s27, %s369_s28  }
  0x24   :  { %s370_s14 = smov [#allocation7]   ;;  %s292_s19 = scalar_lea.hbm %s490_s2, 256 }
  0x25   :  { %s43_s15 = sshll.u32 %s370_s14, 4  ;;  %p293_p2 = scmp.ne.s32.totalorder %s490_s2, %s292_s19  ;;  %s44_s15 = int_to_ptr.vmem [resolvable:$true] %s43_s15 }
  0x26   :  { %p296_p3 = scmp.lt.u32.totalorder %s292_s19, %s490_s2 }
  0x28   :  { %p298_p4 = pnand %p296_p3, %p293_p2 }
  0x2a   :  { %301 = shalt.err (!%p298_p4)
}
  0x2b   :  { %s302_s24 = scalar_lea.vmem %s44_s15, 256  ;;  %p307_p6 = scmp.lt.s32.totalorder %s44_s15, %s44_s15 }
  0x2c   :  { %p303_p5 = scmp.ne.s32.totalorder %s44_s15, %s302_s24  ;;  %p308_p7 = scmp.lt.s32.totalorder %s302_s24, %s302_s24 }
  0x2e   :  { %p309_p8 = por %p308_p7, %p307_p6 }
  0x30   :  { %p310_p9 = pnand %p309_p8, %p303_p5 }
  0x32   :  { %313 = shalt.err (!%p310_p9)
}
  0x33   :  { %49 = dma.hbm_to_vmem [thread:$0]  %s490_s2, 256, %s44_s15, [#allocation6], %s368_s27, %s368_s27, %s369_s28  }
  0x34   :  { %358 = dma.done.wait [#allocation3], 256  }
  0x35   :  { %359 = vsyncadd [#allocation3], 4294967040 }
  0x36   :  { %360 = dma.done.wait [#allocation6], 512  }
  0x37   :  { %361 = vsyncadd [#allocation6], 4294966784  ;;  %v59_v0 = vld [vmem:[#allocation2] sm:$0xff]  ;;  %v71_v2 = vld [vmem:[#allocation5] sm:$0xff]  ;;  %s371_s25 = smov [#allocation8]  }
  0x38   :  { %v61_v1 = vld [vmem:[#allocation7] sm:$0xff]  ;;  %v73_v4 = vmax.f32 %v71_v2, 0.11  ;;  %v60_v5 = vld [vmem:[#allocation2 + $0x8] sm:$0xff]  ;;  %v72_v7 = vld [vmem:[#allocation5 + $0x8] sm:$0xff]  ;;  %s190_s26 = sshll.u32 %s371_s25, 4  ;;  %s191_s26 = int_to_ptr.vmem [resolvable:$true] %s190_s26 }
  0x39   :  { %v63_v3 = vsub.f32 %v59_v0, %v61_v1  ;;  %v62_v6 = vld [vmem:[#allocation7 + $0x8] sm:$0xff]  ;;  %v74_v9 = vmax.f32 %v72_v7, 0.11  ;;  %s314_s2 = scalar_lea.vmem %s191_s26, 256  ;;  %p319_p11 = scmp.lt.s32.totalorder %s191_s26, %s191_s26 }
  0x3a   :  { %v64_v8 = vsub.f32 %v60_v5, %v62_v6  ;;  %228 = vrcp.f32 %v73_v4  ;;  %p315_p10 = scmp.ne.s32.totalorder %s191_s26, %s314_s2  ;;  %p320_p12 = scmp.lt.s32.totalorder %s314_s2, %s314_s2 }
  0x3b   :  { %v219_v10 = vround.rtne.f32 %v63_v3  ;;  %230 = vrcp.f32 %v74_v9 }
  0x3c   :  { %v220_v11 = vround.rtne.f32 %v64_v8  ;;  %p321_p13 = por %p320_p12, %p319_p11 }
  0x3d   :  { %v67_v12 = vadd.f32 %v219_v10, %v61_v1 }
  0x3e   :  { %v68_v13 = vadd.f32 %v220_v11, %v62_v6  ;;  %p322_p0 = pnand %p321_p13, %p315_p10 }
  0x3f   :  { %69 = vst [vmem:[#allocation8] sm:$0xff] %v67_v12  ;;  %v79_v14 = vsub.f32 %v67_v12, %v61_v1 }
  0x40   :  { %70 = vst [vmem:[#allocation8 + $0x8] sm:$0xff] %v68_v13  ;;  %v80_v15 = vsub.f32 %v68_v13, %v62_v6 }
  0x41   :  { %v81_v16 = vand.u32 2147483647, %v79_v14 }
  0x42   :  { %325 = shalt.err (!%p322_p0)
}
  0x43   :  { %s326_s5 = scalar_lea.hbm %s491_s3, 256 }
  0x44   :  { %p327_p1 = scmp.ne.s32.totalorder %s491_s3, %s326_s5  ;;  %p330_p2 = scmp.lt.u32.totalorder %s326_s5, %s491_s3 }
  0x46   :  { %p332_p3 = pnand %p330_p2, %p327_p1 }
  0x48   :  { %335 = shalt.err (!%p332_p3)
}
  0x49   :  { %196 = dma.vmem_to_hbm [thread:$0]  %s191_s26, 256, %s491_s3, [#allocation4], %s368_s27, %s368_s27, %s369_s28   ;;  %v82_v17 = vand.u32 2147483647, %v80_v15  ;;  %v83_v18 = vsub.f32 0.5, %v81_v16  ;;  %v135_v19 = vsub.f32 -0.5, %v81_v16  ;;  %v229_v22 = vpop.eup %228 }
  0x4a   :  { %v231_v23 = vpop.eup %230  ;;  %s372_s3 = smov [#allocation9]  }
  0x4b   :  { %v84_v20 = vsub.f32 0.5, %v82_v17  ;;  %v136_v21 = vsub.f32 -0.5, %v82_v17  ;;  %v85_v24 = vmul.f32 %v229_v22, %v83_v18  ;;  %v137_v25 = vmul.f32 %v229_v22, %v135_v19  ;;  %s202_s12 = sshll.u32 %s372_s3, 4  ;;  %s203_s12 = int_to_ptr.vmem [resolvable:$true] %s202_s12 }
  0x4c   :  { %s336_s1 = scalar_lea.vmem %s203_s12, 256  ;;  %p341_p5 = scmp.lt.s32.totalorder %s203_s12, %s203_s12 }
  0x4d   :  { %v86_v26 = vmul.f32 %v231_v23, %v84_v20  ;;  %v138_v27 = vmul.f32 %v231_v23, %v136_v21  ;;  %v139_v28 = vmul.f32 -0.70710677, %v137_v25  ;;  %v465_v29 = vmul.f32 -0.70710677, %v85_v24  ;;  %p337_p4 = scmp.ne.s32.totalorder %s203_s12, %s336_s1  ;;  %p342_p6 = scmp.lt.s32.totalorder %s336_s1, %s336_s1 }
  0x4f   :  { %v140_v30 = vmul.f32 -0.70710677, %v138_v27  ;;  %v467_v31 = vmul.f32 -0.70710677, %v86_v26  ;;  %v141_v32 = vmul.f32 0.3275911, %v139_v28  ;;  %p343_p7 = por %p342_p6, %p341_p5 }
  0x50   :  { %v89_v33 = vand.u32 2147483647, %v465_v29  ;;  %v167_v42 = vsub.f32 0.0, %v139_v28  ;;  %vm127_vm0 = vcmp.ge.f32.partialorder %v465_v29, 0.0 }
  0x51   :  { %v142_v34 = vmul.f32 0.3275911, %v140_v30  ;;  %v90_v35 = vand.u32 2147483647, %v467_v31  ;;  %v143_v36 = vadd.f32 1.0, %v141_v32  ;;  %v168_v43 = vsub.f32 0.0, %v140_v30  ;;  %p344_p8 = pnand %p343_p7, %p337_p4 }
  0x52   :  { %v91_v37 = vmul.f32 0.3275911, %v89_v33  ;;  %v117_v44 = vsub.f32 0.0, %v89_v33  ;;  %v169_v48 = vmul.f32 %v167_v42, %v139_v28  ;;  %vm128_vm1 = vcmp.ge.f32.partialorder %v467_v31, 0.0 }
  0x53   :  { %v144_v38 = vadd.f32 1.0, %v142_v34  ;;  %v92_v39 = vmul.f32 0.3275911, %v90_v35  ;;  %232 = vrcp.f32 %v143_v36  ;;  %v118_v46 = vsub.f32 0.0, %v90_v35 }
  0x54   :  { %v93_v40 = vadd.f32 1.0, %v91_v37  ;;  %v170_v50 = vmul.f32 %v168_v43, %v140_v30  ;;  %v119_v51 = vmul.f32 %v117_v44, %v89_v33  ;;  %v171_v57 = vmul.f32 1.442695, %v169_v48 }
  0x55   :  { %234 = vrcp.f32 %v144_v38  ;;  %v94_v41 = vadd.f32 1.0, %v92_v39  ;;  %v120_v55 = vmul.f32 %v118_v46, %v90_v35 }
  0x56   :  { %236 = vrcp.f32 %v93_v40  ;;  %v173_v61 = vmul.f32 1.442695, %v170_v50  ;;  %v121_v62 = vmul.f32 1.442695, %v119_v51 }
  0x57   :  { %238 = vrcp.f32 %v94_v41  ;;  %v123_v3 = vmul.f32 1.442695, %v120_v55 }
  0x58   :  { %240 = vpow2.f32 %v171_v57 }
  0x59   :  { %242 = vpow2.f32 %v121_v62 }
  0x5a   :  { %244 = vpow2.f32 %v173_v61 }
  0x5b   :  { %246 = vpow2.f32 %v123_v3 }
  0x5d   :  { %v233_v45 = vpop.eup %232 }
  0x5e   :  { %v149_v49 = vmul.f32 1.0614054, %v233_v45 }
  0x5f   :  { %v235_v47 = vpop.eup %234 }
  0x60   :  { %v150_v52 = vmul.f32 1.0614054, %v235_v47  ;;  %v151_v53 = vadd.f32 -1.4531521, %v149_v49  ;;  %v237_v54 = vpop.eup %236 }
  0x61   :  { %v99_v58 = vmul.f32 1.0614054, %v237_v54  ;;  %v239_v60 = vpop.eup %238 }
  0x62   :  { %v152_v56 = vadd.f32 -1.4531521, %v150_v52  ;;  %v153_v59 = vmul.f32 %v233_v45, %v151_v53  ;;  %v100_v2 = vmul.f32 1.0614054, %v239_v60  ;;  %v241_v24 = vpop.eup %240 }
  0x63   :  { %v101_v0 = vadd.f32 -1.4531521, %v99_v58  ;;  %v243_v27 = vpop.eup %242 }
  0x64   :  { %v154_v63 = vmul.f32 %v235_v47, %v152_v56  ;;  %v155_v1 = vadd.f32 1.4214138, %v153_v59  ;;  %v102_v7 = vadd.f32 -1.4531521, %v100_v2  ;;  %v245_v30 = vpop.eup %244 }
  0x65   :  { %v103_v5 = vmul.f32 %v237_v54, %v101_v0  ;;  %v247_v34 = vpop.eup %246 }
  0x66   :  { %v156_v4 = vadd.f32 1.4214138, %v154_v63  ;;  %v157_v6 = vmul.f32 %v233_v45, %v155_v1  ;;  %v104_v11 = vmul.f32 %v239_v60, %v102_v7 }
  0x67   :  { %v105_v9 = vadd.f32 1.4214138, %v103_v5 }
  0x68   :  { %v158_v8 = vmul.f32 %v235_v47, %v156_v4  ;;  %v159_v10 = vadd.f32 -0.28449672, %v157_v6  ;;  %v106_v15 = vadd.f32 1.4214138, %v104_v11 }
  0x69   :  { %v107_v13 = vmul.f32 %v237_v54, %v105_v9 }
  0x6a   :  { %v160_v12 = vadd.f32 -0.28449672, %v158_v8  ;;  %v161_v14 = vmul.f32 %v233_v45, %v159_v10  ;;  %v108_v19 = vmul.f32 %v239_v60, %v106_v15 }
  0x6b   :  { %v109_v17 = vadd.f32 -0.28449672, %v107_v13 }
  0x6c   :  { %v162_v16 = vmul.f32 %v235_v47, %v160_v12  ;;  %v163_v18 = vadd.f32 0.2548296, %v161_v14  ;;  %v110_v22 = vadd.f32 -0.28449672, %v108_v19 }
  0x6d   :  { %v111_v21 = vmul.f32 %v237_v54, %v109_v17 }
  0x6e   :  { %v164_v20 = vadd.f32 0.2548296, %v162_v16  ;;  %v165_v23 = vmul.f32 %v233_v45, %v163_v18  ;;  %v112_v26 = vmul.f32 %v239_v60, %v110_v22 }
  0x6f   :  { %v113_v25 = vadd.f32 0.2548296, %v111_v21 }
  0x70   :  { %v166_v28 = vmul.f32 %v235_v47, %v164_v20  ;;  %v114_v33 = vadd.f32 0.2548296, %v112_v26  ;;  %v175_v35 = vmul.f32 %v241_v24, %v165_v23 }
  0x71   :  { %v115_v32 = vmul.f32 %v237_v54, %v113_v25 }
  0x72   :  { %v116_v37 = vmul.f32 %v239_v60, %v114_v33  ;;  %v176_v38 = vmul.f32 %v245_v30, %v166_v28  ;;  %v177_v41 = vmul.f32 0.5, %v175_v35 }
  0x73   :  { %v125_v36 = vmul.f32 %v243_v27, %v115_v32 }
  0x74   :  { %v126_v40 = vmul.f32 %v247_v34, %v116_v37  ;;  %v178_v45 = vmul.f32 0.5, %v176_v38 }
  0x75   :  { %v129_v39 = vsub.f32 2.0, %v125_v36 }
  0x76   :  { %v130_v43 = vsub.f32 2.0, %v126_v40 }
  0x77   :  { %v131_v42 = vsel %vm127_vm0, %v125_v36, %v129_v39 }
  0x78   :  { %v133_v44 = vmul.f32 0.5, %v131_v42  ;;  %v132_v46 = vsel %vm128_vm1, %v126_v40, %v130_v43 }
  0x79   :  { %v134_v48 = vmul.f32 0.5, %v132_v46 }
  0x7a   :  { %v179_v47 = vsub.f32 %v133_v44, %v177_v41 }
  0x7b   :  { %v180_v50 = vsub.f32 %v134_v48, %v178_v45 }
  0x7c   :  { %v181_v49 = vmax.f32 %v179_v47, 1e-09 }
  0x7d   :  { %v182_v51 = vmax.f32 %v180_v50, 1e-09 }
  0x7e   :  { %183 = vst [vmem:[#allocation9] sm:$0xff] %v181_v49 }
  0x7f   :  { %184 = vst [vmem:[#allocation9 + $0x8] sm:$0xff] %v182_v51 }
  0x80   :  { %347 = shalt.err (!%p344_p8)
}
  0x81   :  { %s348_s15 = scalar_lea.hbm %s492_s4, 256 }
  0x82   :  { %p349_p9 = scmp.ne.s32.totalorder %s492_s4, %s348_s15  ;;  %p352_p10 = scmp.lt.u32.totalorder %s348_s15, %s492_s4 }
  0x84   :  { %p354_p11 = pnand %p352_p10, %p349_p9 }
  0x86   :  { %357 = shalt.err (!%p354_p11)
}
  0x87   :  { %208 = dma.vmem_to_hbm [thread:$0]  %s203_s12, 256, %s492_s4, [#allocation10], %s368_s27, %s368_s27, %s369_s28  }
  0x88   :  { %362 = dma.done.wait [#allocation4], 256  }
  0x89   :  { %363 = vsyncadd [#allocation4], 4294967040 }
  0x8a   :  { %364 = dma.done.wait [#allocation10], 256  }
  0x8b   :  { %365 = vsyncadd [#allocation10], 4294967040 }
  0x8c   :  { %215 = vsyncpa [#allocation3], 1 }
  0x8d   :  { %216 = vsyncpa [#allocation6], 1 }
  0x8e   :  { %217 = vsyncpa [#allocation4], 1 }
  0x8f   :  { %218 = vsyncpa [#allocation10], 1 }

</bundles_post_ra>
